<compile_context>
chip_gen: v7x
topology: tpu7x:2x2x1
jax: 0.10.0
libtpu: 0.0.40
codegen_flags: <defaults>
</compile_context>

<pallas_src>
import functools

import jax
import jax.numpy as jnp
from jax import lax
from jax.experimental import pallas as pl
from jax.experimental.pallas import tpu as pltpu


def _round_up(x: int, m: int) -> int:
    return ((x + m - 1) // m) * m


def _linear_kernel_acc(x_ref, w_ref, b_ref, o_ref, acc_ref):
    # x_ref: (tm, tk)   w_ref: (tn, tk)   b_ref: (1, tn)
    # o_ref: (tm, tn)   acc_ref: (tm, tn) f32 scratch
    k = pl.program_id(2)

    @pl.when(k == 0)
    def _():
        acc_ref[...] = jnp.zeros_like(acc_ref)

    # Contract over F (dim 1 of both operands): (tm, tk) x (tn, tk) -> (tm, tn)
    acc_ref[...] += lax.dot_general(
        x_ref[...],
        w_ref[...],
        dimension_numbers=(((1,), (1,)), ((), ())),
        preferred_element_type=jnp.float32,
    )

    @pl.when(k == pl.num_programs(2) - 1)
    def _():
        o_ref[...] = (acc_ref[...] + b_ref[...]).astype(o_ref.dtype)


def _linear_kernel_single_k(x_ref, w_ref, b_ref, o_ref):
    # Whole F dim fits in one tile: no accumulator scratch, no extra copy.
    acc = lax.dot_general(
        x_ref[...],
        w_ref[...],
        dimension_numbers=(((1,), (1,)), ((), ())),
        preferred_element_type=jnp.float32,
    )
    o_ref[...] = (acc + b_ref[...]).astype(o_ref.dtype)


def classifier_forward(x, weight, bias, *, tm=None, tn=None, tk=None,
                       compute_dtype=None):
    """Equivalent of nn.Linear(feature_dim, num_classes)(x).

    x:      (..., F)
    weight: (C, F)   (native PyTorch Linear layout -- no transpose needed)
    bias:   (C,)
    returns (..., C) in x.dtype
    """
    *lead, F = x.shape
    C, F_w = weight.shape
    assert F == F_w, "weight feature dim must match x feature dim"
    out_dtype = x.dtype

    x2 = x.reshape(-1, F)
    B = x2.shape[0]

    # Optional bf16 MXU path (v6e/v7x); accumulation stays f32 in the kernel.
    if compute_dtype is not None:
        x2 = x2.astype(compute_dtype)
        weight = weight.astype(compute_dtype)

    # 8/128-aligned tile sizes, capped so VMEM stays small for big heads.
    if tm is None:
        tm = min(256, _round_up(B, 8))
    if tn is None:
        tn = min(512, _round_up(C, 128))      # lane-dense output tiles
    if tk is None:
        tk = min(512, _round_up(F, 128))

    Bp = _round_up(B, tm)
    Cp = _round_up(C, tn)
    Fp = _round_up(F, tk)

    # Zero-pad to tile-aligned shapes (zeros contribute nothing to the dot).
    xp = x2 if (Bp == B and Fp == F) else jnp.pad(
        x2, ((0, Bp - B), (0, Fp - F)))
    wp = weight if (Cp == C and Fp == F) else jnp.pad(
        weight, ((0, Cp - C), (0, Fp - F)))
    bp = bias if Cp == C else jnp.pad(bias, (0, Cp - C))
    bp = bp.reshape(1, Cp).astype(jnp.float32)

    nk = Fp // tk
    grid = (Bp // tm, Cp // tn, nk)

    cost = pl.CostEstimate(
        flops=2 * B * F * C,
        transcendentals=0,
        bytes_accessed=xp.dtype.itemsize * (B * F)
        + wp.dtype.itemsize * (C * F)
        + 4 * C
        + jnp.dtype(out_dtype).itemsize * (B * C),
    )

    common = dict(
        out_shape=jax.ShapeDtypeStruct((Bp, Cp), out_dtype),
        grid=grid,
        in_specs=[
            pl.BlockSpec((tm, tk), lambda i, j, k: (i, k)),   # x tile
            pl.BlockSpec((tn, tk), lambda i, j, k: (j, k)),   # weight tile (C,F)
            pl.BlockSpec((1, tn), lambda i, j, k: (0, j)),    # bias tile
        ],
        out_specs=pl.BlockSpec((tm, tn), lambda i, j, k: (i, j)),
        compiler_params=pltpu.CompilerParams(
            dimension_semantics=("parallel", "parallel", "arbitrary"),
        ),
        cost_estimate=cost,
    )

    if nk == 1:
        out = pl.pallas_call(_linear_kernel_single_k, **common)(xp, wp, bp)
    else:
        out = pl.pallas_call(
            _linear_kernel_acc,
            scratch_shapes=[pltpu.VMEM((tm, tn), jnp.float32)],
            **common,
        )(xp, wp, bp)

    # Slice off batch / class padding and restore leading dims.
    if Bp != B or Cp != C:
        out = out[:B, :C]
    return out.reshape(*lead, C)


if __name__ == "__main__":
    key = jax.random.PRNGKey(0)
    kx, kw, kx2, kw2 = jax.random.split(key, 4)

    # --- Small shape consistent with the module (single-K fast path) ---
    B, feature_dim, num_classes = 8, 32, 10
    x = jax.random.normal(kx, (B, feature_dim), dtype=jnp.float32)
    # Deterministic init matching the module: weight ~ N(0, 0.001), bias = 0.
    weight = 0.001 * jax.random.normal(
        kw, (num_classes, feature_dim), dtype=jnp.float32)
    bias = jnp.zeros((num_classes,), dtype=jnp.float32)

    fwd = jax.jit(functools.partial(classifier_forward))
    y = fwd(x, weight, bias)
    jax.block_until_ready(y)
    y_ref = x @ weight.T + bias
    assert y.shape == (B, num_classes)
    assert jnp.allclose(y, y_ref, atol=1e-5, rtol=1e-5)

    # --- Larger feature dim to exercise the K-reduction / accumulator path ---
    F2, C2 = 1536, 10
    x2 = jax.random.normal(kx2, (B, F2), dtype=jnp.float32)
    w2 = 0.001 * jax.random.normal(kw2, (C2, F2), dtype=jnp.float32)
    b2 = jnp.zeros((C2,), dtype=jnp.float32)
    y2 = fwd(x2, w2, b2)
    jax.block_until_ready(y2)
    y2_ref = x2 @ w2.T + b2
    assert y2.shape == (B, C2)
    assert jnp.allclose(y2, y2_ref, atol=1e-5, rtol=1e-5)

    print("KERNEL_OK")
</pallas_src>

<mosaic_0001>
module attributes {stable_mosaic.version = 11 : i64} {
  func.func @_linear_kernel_single_k(%arg0: i32, %arg1: i32, %arg2: i32, %arg3: memref<8x128xf32, #tpu.memory_space<vmem>>, %arg4: memref<128x128xf32, #tpu.memory_space<vmem>>, %arg5: memref<1x128xf32, #tpu.memory_space<vmem>>, %arg6: memref<8x128xf32, #tpu.memory_space<vmem>>) attributes {dimension_semantics = [#tpu.dimension_semantics<parallel>, #tpu.dimension_semantics<parallel>, #tpu.dimension_semantics<arbitrary>], iteration_bounds = array<i64: 1, 1, 1>, scalar_prefetch = 0 : i64, scratch_operands = 0 : i64, tpu.core_type = #tpu.core_type<tc>, window_params = [{transform_indices = @transform_0, window_bounds = array<i64: 8, 128>}, {transform_indices = @transform_1, window_bounds = array<i64: 128, 128>}, {transform_indices = @transform_2, window_bounds = array<i64: 1, 128>}, {transform_indices = @transform_3, window_bounds = array<i64: 8, 128>}]} {
    %c0 = arith.constant 0 : index
    %c0_0 = arith.constant 0 : index
    %0 = vector.load %arg3[%c0, %c0_0] : memref<8x128xf32, #tpu.memory_space<vmem>>, vector<8x128xf32>
    %c0_1 = arith.constant 0 : index
    %c0_2 = arith.constant 0 : index
    %1 = vector.load %arg4[%c0_1, %c0_2] : memref<128x128xf32, #tpu.memory_space<vmem>>, vector<128x128xf32>
    %cst = arith.constant dense<0.000000e+00> : vector<8x128xf32>
    %2 = tpu.matmul %0, %1, %cst {dimension_numbers = #tpu.dot_dimension_numbers<[1], [1], [0], [0], [0, 0, 1, 0], [], []>} : vector<8x128xf32>, vector<128x128xf32>, vector<8x128xf32> -> vector<8x128xf32>
    %c0_3 = arith.constant 0 : index
    %c0_4 = arith.constant 0 : index
    %3 = vector.load %arg5[%c0_3, %c0_4] : memref<1x128xf32, #tpu.memory_space<vmem>>, vector<1x128xf32>
    %4 = vector.broadcast %3 : vector<1x128xf32> to vector<8x128xf32>
    %5 = arith.addf %2, %4 : vector<8x128xf32>
    %c0_5 = arith.constant 0 : index
    %c0_6 = arith.constant 0 : index
    %6 = vector.load %arg6[%c0_5, %c0_6] : memref<8x128xf32, #tpu.memory_space<vmem>>, vector<8x128xf32>
    tpu.vector_store %arg6[%c0_5, %c0_6], %5 {strides = array<i32>} : memref<8x128xf32, #tpu.memory_space<vmem>>, vector<8x128xf32>,
    return
  }
  func.func @transform_0(%arg0: i32, %arg1: i32, %arg2: i32) -> (i32, i32) {
    %c0_i32 = arith.constant 0 : i32
    return %arg0, %arg2 : i32, i32
  }
  func.func @transform_1(%arg0: i32, %arg1: i32, %arg2: i32) -> (i32, i32) {
    %c0_i32 = arith.constant 0 : i32
    return %arg1, %arg2 : i32, i32
  }
  func.func @transform_2(%arg0: i32, %arg1: i32, %arg2: i32) -> (i32, i32) {
    %c0_i32 = arith.constant 0 : i32
    %c0_i32_0 = arith.constant 0 : i32
    return %c0_i32, %arg1 : i32, i32
  }
  func.func @transform_3(%arg0: i32, %arg1: i32, %arg2: i32) -> (i32, i32) {
    %c0_i32 = arith.constant 0 : i32
    return %arg0, %arg1 : i32, i32
  }
}

</mosaic_0001>

<bundles_post_ra>
// kernel: classifier_forward.1
= control target key start
LH: loop header
LB: loop body
LE: loop exit
PB: predicated region body
PF: predicated region fallthrough
CT: control target
= control target key end

     0   :  { %v229_v2 = vmov 0.0|0.0   ;;  %vm230_vm0 = vmmov 0   ;;  %v231_v4 = vmov 0.0   ;;  %s319_s0 = inlined_call_operand.vmem [shape: f32[8,128], index: 0, kind: input, shape index: {}]   ;;  %s320_s1 = inlined_call_operand.vmem [shape: f32[128,128], index: 1, kind: input, shape index: {}]   ;;  %s321_s2 = inlined_call_operand.vmem [shape: f32[1,128], index: 2, kind: input, shape index: {}]   ;;  %s322_s3 = inlined_call_operand.hbm [shape: f32[8,128], index: 3, kind: output, shape index: {}]  }
   0x1   :  { %v16_v0 = vld [vmem:[%s320_s1] sm:$0xff]  ;;  %v17_v1 = vld [vmem:[%s320_s1 + $0x8] sm:$0xff]  ;;  %177 = vmatprep.subr.bf16.mxu0 %v229_v2  ;;  %174 = vmatprep.mubr.msk.f32.mxu0 %vm230_vm0, %v231_v4  ;;  %v18_v5 = vld [vmem:[%s320_s1 + $0x10] sm:$0xff] }
   0x2   :  { %v178_v3 = vpack.c.bf16 %v17_v1, %v16_v0  ;;  %v19_v6 = vld [vmem:[%s320_s1 + $0x18] sm:$0xff] }
   0x4   :  { %179 = vmatpush3.bf16.xpose.msra.mxu0 %v178_v3 }
   0x5   :  { %180 = vmatprep.subr.bf16.mxu0 %v229_v2 }
   0x6   :  { %8 = vsyncpa [#allocation3], 0  ;;  %v181_v7 = vpack.c.bf16 %v19_v6, %v18_v5  ;;  %v20_v8 = vld [vmem:[%s320_s1 + $0x20] sm:$0xff]  ;;  %v21_v9 = vld [vmem:[%s320_s1 + $0x28] sm:$0xff]  ;;  %s232_s21 = smov [#allocation2]  }
   0x7   :  { %v184_v10 = vpack.c.bf16 %v21_v9, %v20_v8  ;;  %v22_v11 = vld [vmem:[%s320_s1 + $0x30] sm:$0xff]  ;;  %v23_v12 = vld [vmem:[%s320_s1 + $0x38] sm:$0xff]  ;;  %v24_v14 = vld [vmem:[%s320_s1 + $0x40] sm:$0xff]  ;;  %s116_s22 = sshll.u32 %s232_s21, 4  ;;  %s117_s22 = int_to_ptr.vmem [resolvable:$true] %s116_s22 }
   0x8   :  { %v187_v13 = vpack.c.bf16 %v23_v12, %v22_v11  ;;  %v25_v15 = vld [vmem:[%s320_s1 + $0x48] sm:$0xff]  ;;  %v26_v17 = vld [vmem:[%s320_s1 + $0x50] sm:$0xff]  ;;  %v27_v18 = vld [vmem:[%s320_s1 + $0x58] sm:$0xff]  ;;  %s205_s23 = scalar_lea.vmem %s117_s22, 128  ;;  %p210_p1 = scmp.lt.s32.totalorder %s117_s22, %s117_s22 }
   0x9   :  { %v190_v16 = vpack.c.bf16 %v25_v15, %v24_v14  ;;  %v193_v19 = vpack.c.bf16 %v27_v18, %v26_v17  ;;  %v28_v20 = vld [vmem:[%s320_s1 + $0x60] sm:$0xff]  ;;  %v29_v21 = vld [vmem:[%s320_s1 + $0x68] sm:$0xff]  ;;  %v30_v23 = vld [vmem:[%s320_s1 + $0x70] sm:$0xff]  ;;  %p206_p0 = scmp.ne.s32.totalorder %s117_s22, %s205_s23  ;;  %p211_p2 = scmp.lt.s32.totalorder %s205_s23, %s205_s23 }
   0xa   :  { %v196_v22 = vpack.c.bf16 %v29_v21, %v28_v20  ;;  %v31_v24 = vld [vmem:[%s320_s1 + $0x78] sm:$0xff]  ;;  %v15_v26 = vld [vmem:[%s319_s0] sm:$0xff] }
   0xb   :  { %v199_v25 = vpack.c.bf16 %v31_v24, %v30_v23  ;;  %v124_v27 = vld [vmem:[%s321_s2] ss:$0 sm:$0xff]  ;;  %p212_p3 = por %p211_p2, %p210_p1 }
   0xc   :  { %182 = vmatpush3.bf16.xpose.msra.mxu0 %v181_v7 }
   0xd   :  { %183 = vmatprep.subr.bf16.mxu0 %v229_v2  ;;  %p213_p4 = pnand %p212_p3, %p206_p0 }
  0x14   :  { %185 = vmatpush3.bf16.xpose.msra.mxu0 %v184_v10 }
  0x15   :  { %186 = vmatprep.subr.bf16.mxu0 %v229_v2 }
  0x1c   :  { %188 = vmatpush3.bf16.xpose.msra.mxu0 %v187_v13 }
  0x1d   :  { %189 = vmatprep.subr.bf16.mxu0 %v229_v2 }
  0x24   :  { %191 = vmatpush3.bf16.xpose.msra.mxu0 %v190_v16 }
  0x25   :  { %192 = vmatprep.subr.bf16.mxu0 %v229_v2 }
  0x2c   :  { %194 = vmatpush3.bf16.xpose.msra.mxu0 %v193_v19 }
  0x2d   :  { %195 = vmatprep.subr.bf16.mxu0 %v229_v2 }
  0x34   :  { %197 = vmatpush3.bf16.xpose.msra.mxu0 %v196_v22 }
  0x35   :  { %198 = vmatprep.subr.bf16.mxu0 %v229_v2 }
  0x3c   :  { %200 = vmatpush3.bf16.xpose.msra.mxu0 %v199_v25 }
  0x43   :  { %175 = vmatmul.mubr.f32.vlgmr.msra.gmra.mrb[0].mxu0 %v15_v26 }
 0x116   :  { %v105_v28 = vpop.f32.mrb[0].mxu0 }
 0x117   :  { %v106_v29 = vadd.f32 %v124_v27, %v105_v28  ;;  %v176_v30 = vpop.f32.mrb[1].mxu0 }
 0x119   :  { %109 = vst [vmem:[#allocation2] sm:$0xff] %v106_v29 }
 0x11a   :  { %216 = shalt.err (!%p213_p4)
}
 0x11b   :  { %s217_s24 = scalar_lea.hbm %s322_s3, 128 }
 0x11c   :  { %p218_p5 = scmp.ne.s32.totalorder %s322_s3, %s217_s24  ;;  %p221_p6 = scmp.lt.u32.totalorder %s217_s24, %s322_s3 }
 0x11e   :  { %p223_p7 = pnand %p221_p6, %p218_p5 }
 0x120   :  { %226 = shalt.err (!%p223_p7)
}
 0x121   :  { %119 = dma.vmem_to_hbm [thread:$0]  %s117_s22, 128, %s322_s3, [#allocation3]  }
 0x122   :  { %227 = dma.done.wait [#allocation3], 128  }
 0x123   :  { %228 = vsyncadd [#allocation3], 4294967168 }
 0x124   :  { %123 = vsyncpa [#allocation3], 1 }

</bundles_post_ra>
